<compile_context>
chip_gen: v6e
topology: v6e:2x2x1
jax: 0.10.0
libtpu: 0.0.40
codegen_flags: <defaults>
</compile_context>

<pallas_src>
import math

import jax
import jax.numpy as jnp
from jax import lax
from jax.experimental import pallas as pl
from jax.experimental.pallas import tpu as pltpu


# -----------------------------------------------------------------------------
# Kernel: one (batch, q-tile, head, k-tile) grid step.
# -----------------------------------------------------------------------------
def _flash_attention_kernel(q_ref, k_ref, v_ref, wo_ref, bo_ref, out_ref,
                            m_ref, l_ref, ctx_ref, acc_ref):
    """
    q_ref   : (1, 1, TQ, hd) bf16  pre-projected, pre-scaled query head tile
    k_ref   : (1, 1, TK, hd) bf16  pre-projected key head tile
    v_ref   : (1, 1, TK, hd) bf16  pre-projected value head tile
    wo_ref  : (H, hd, D)     bf16  output projection weight, split per head
    bo_ref  : (1, D)         f32   output projection bias
    out_ref : (1, TQ, D)           output tile (stored once, on the last step)
    m_ref   : (TQ, 1)  f32  running softmax max          (reset per head)
    l_ref   : (TQ, 1)  f32  running softmax denominator  (reset per head)
    ctx_ref : (TQ, hd) f32  running unnormalised context (reset per head)
    acc_ref : (TQ, D)  f32  output accumulator over heads
    """
    f32 = jnp.float32
    bf16 = jnp.bfloat16

    h = pl.program_id(2)
    kv = pl.program_id(3)
    num_heads = pl.num_programs(2)
    num_kv = pl.num_programs(3)

    @pl.when((h == 0) & (kv == 0))
    def _init_output_accumulator():
        acc_ref[...] = jnp.zeros(acc_ref.shape, dtype=acc_ref.dtype)

    @pl.when(kv == 0)
    def _init_softmax_state():
        m_ref[...] = jnp.full(m_ref.shape, -jnp.inf, dtype=m_ref.dtype)
        l_ref[...] = jnp.zeros(l_ref.shape, dtype=l_ref.dtype)
        ctx_ref[...] = jnp.zeros(ctx_ref.shape, dtype=ctx_ref.dtype)

    q = q_ref[0, 0]                                        # (TQ, hd) bf16
    k = k_ref[0, 0]                                        # (TK, hd) bf16
    v = v_ref[0, 0]                                        # (TK, hd) bf16

    # scores = q @ k^T with no materialised transpose (contract last dims on
    # the MXU); q already carries the 1/sqrt(head_dim) scale.
    s = lax.dot_general(q, k, dimension_numbers=(((1,), (1,)), ((), ())),
                        preferred_element_type=f32)        # (TQ, TK) f32

    # Online-softmax update; all statistics kept in f32.
    m_prev = m_ref[...]
    m_new = jnp.maximum(m_prev, jnp.max(s, axis=-1, keepdims=True))
    alpha = jnp.exp(m_prev - m_new)                        # (TQ, 1)
    p = jnp.exp(s - m_new)                                 # (TQ, TK)
    l_ref[...] = alpha * l_ref[...] + jnp.sum(p, axis=-1, keepdims=True)
    ctx_ref[...] = alpha * ctx_ref[...] + jnp.dot(
        p.astype(bf16), v, preferred_element_type=f32)     # (TQ, hd)
    m_ref[...] = m_new
    # (dropout on the attention probabilities == identity in eval mode)

    @pl.when(kv == num_kv - 1)
    def _finalize_head():
        inv_l = pl.reciprocal(l_ref[...], approx=True)     # EUP slot
        ctx = (ctx_ref[...] * inv_l).astype(bf16)          # (TQ, hd)
        # Fused output projection: out = sum_h ctx_h @ Wo[h] + bo.
        acc_ref[...] += jnp.dot(ctx, wo_ref[h], preferred_element_type=f32)

    @pl.when((h == num_heads - 1) & (kv == num_kv - 1))
    def _store_output():
        out_ref[0] = (acc_ref[...] + bo_ref[...]).astype(out_ref.dtype)


# -----------------------------------------------------------------------------
# Wrapper
# -----------------------------------------------------------------------------
def _pick_tile(length, requested):
    if requested is not None:
        assert length % requested == 0, (length, requested)
        return requested
    for cand in (512, 256, 128):
        if length % cand == 0:
            return cand
    return length


def _vmem_limit_bytes(needed_bytes):
    cap = 64 * 1024 * 1024            # conservative default (v7x per-TC VMEM)
    try:
        cap = int(pltpu.get_tpu_info().vmem_capacity_bytes)
    except Exception:                 # query unsupported on this JAX / device
        pass
    upper = (cap * 3) // 4            # leave headroom for compiler scratch
    return int(min(upper, max(32 * 1024 * 1024, 2 * needed_bytes + (8 << 20))))


def attention_layer(query, key, value, params, *, n_heads,
                    block_q=None, block_k=None):
    """Pallas-backed AttentionLayer forward (mask=None, dropout in eval mode)."""
    B, QL, D = query.shape
    _, KL, _ = key.shape
    assert D % n_heads == 0, "d_model must be divisible by n_heads"
    H = n_heads
    hd = D // H
    scale = 1.0 / math.sqrt(hd)

    wq, bq, wk, bk, wv, bv, wo, bo = params

    # ---- Projections hoisted out of the kernel: one lane-dense XLA matmul
    # ---- each, then a pure-layout head split + bf16 cast.
    def project(x, w, b):                                  # (B,L,D) -> (B,H,L,hd)
        y = x @ w + b
        bsz, length, _ = x.shape
        y = y.reshape(bsz, length, H, hd).transpose(0, 2, 1, 3)
        return y.astype(jnp.bfloat16)

    q_h = project(query, wq * scale, bq * scale)           # scale folded into Q
    k_h = project(key, wk, bk)
    v_h = project(value, wv, bv)

    wo_h = wo.reshape(H, hd, D).astype(jnp.bfloat16)       # (H, hd, D)
    bo2 = bo.reshape(1, D).astype(jnp.float32)             # (1, D)

    # ---- Tile sizes / grid.
    tq = _pick_tile(QL, block_q)
    tk = _pick_tile(KL, block_k)
    if block_q is None:
        # Make sure both TensorCores get work on dual-core parts (v7x).
        while B * (QL // tq) < 2 and tq > 128 and QL % (tq // 2) == 0:
            tq //= 2
    grid = (B, QL // tq, H, KL // tk)

    # ---- VMEM budget: double-buffered activation tiles + weights + scratch.
    needed = (2 * tq * hd * 2                  # Q tile (bf16, x2 buffers)
              + 2 * 2 * tk * hd * 2            # K and V tiles
              + 2 * tq * D * 4                 # output tile (f32)
              + 2 * (H * hd * D * 2 + D * 4)   # Wo + bo (worst case x2 buffers)
              + tq * (2 + hd + D) * 4)         # m, l, ctx, acc scratch
    vmem_limit = _vmem_limit_bytes(needed)

    cost = pl.CostEstimate(
        flops=int(4 * B * QL * KL * D + 2 * B * QL * D * D),
        transcendentals=int(B * H * QL * (KL + 1)),
        bytes_accessed=int(2 * B * QL * D
                           + 2 * 2 * B * KL * D * (QL // tq)
                           + 2 * H * hd * D + 4 * D
                           + 4 * B * QL * D),
    )

    def build(weight_mode):
        mode_kwargs = {} if weight_mode is None else {"pipeline_mode": weight_mode}
        q_spec = pl.BlockSpec((1, 1, tq, hd), lambda b, qi, h, kv: (b, h, qi, 0))
        k_spec = pl.BlockSpec((1, 1, tk, hd), lambda b, qi, h, kv: (b, h, kv, 0))
        v_spec = pl.BlockSpec((1, 1, tk, hd), lambda b, qi, h, kv: (b, h, kv, 0))
        wo_spec = pl.BlockSpec((H, hd, D), lambda b, qi, h, kv: (0, 0, 0),
                               **mode_kwargs)
        bo_spec = pl.BlockSpec((1, D), lambda b, qi, h, kv: (0, 0), **mode_kwargs)
        out_spec = pl.BlockSpec((1, tq, D), lambda b, qi, h, kv: (b, qi, 0))

        return pl.pallas_call(
            _flash_attention_kernel,
            out_shape=jax.ShapeDtypeStruct((B, QL, D), query.dtype),
            grid_spec=pltpu.PrefetchScalarGridSpec(
                num_scalar_prefetch=0,
                grid=grid,
                in_specs=[q_spec, k_spec, v_spec, wo_spec, bo_spec],
                out_specs=out_spec,
                scratch_shapes=[
                    pltpu.VMEM((tq, 1), jnp.float32),    # running max
                    pltpu.VMEM((tq, 1), jnp.float32),    # running denominator
                    pltpu.VMEM((tq, hd), jnp.float32),   # running context
                    pltpu.VMEM((tq, D), jnp.float32),    # output accumulator
                ]),
            compiler_params=pltpu.CompilerParams(
                dimension_semantics=("parallel", "parallel",
                                     "arbitrary", "arbitrary"),
                vmem_limit_bytes=vmem_limit),
            cost_estimate=cost,
        )

    args = (q_h, k_h, v_h, wo_h, bo2)
    try:
        # Constant-index weight blocks are fetched once -> single buffering.
        out = jax.block_until_ready(build(pl.Buffered(1))(*args))
    except Exception:
        # Fallback for JAX versions without BlockSpec(pipeline_mode=...).
        out = build(None)(*args)
    return out


# -----------------------------------------------------------------------------
# Pure-JAX reference (mirrors the PyTorch forward, mask=None, eval mode)
# -----------------------------------------------------------------------------
def _reference(query, key, value, params, *, n_heads):
    B, QL, D = query.shape
    _, KL, _ = key.shape
    hd = D // n_heads
    wq, bq, wk, bk, wv, bv, wo, bo = params
    Q = (query @ wq + bq).reshape(B, QL, n_heads, hd).transpose(0, 2, 1, 3)
    K = (key @ wk + bk).reshape(B, KL, n_heads, hd).transpose(0, 2, 1, 3)
    V = (value @ wv + bv).reshape(B, KL, n_heads, hd).transpose(0, 2, 1, 3)
    scores = jnp.einsum("bhqd,bhkd->bhqk", Q, K) / math.sqrt(hd)
    attn = jax.nn.softmax(scores, axis=-1)
    out = jnp.einsum("bhqk,bhkd->bhqd", attn, V)
    out = out.transpose(0, 2, 1, 3).reshape(B, QL, D)
    return out @ wo + bo


def _init_linear(rng, in_features, out_features):
    """Deterministic nn.Linear-style init; W pre-transposed to (in, out)."""
    kw, kb = jax.random.split(rng)
    bound = 1.0 / math.sqrt(in_features)
    w = jax.random.uniform(kw, (in_features, out_features), jnp.float32,
                           -bound, bound)
    b = jax.random.uniform(kb, (out_features,), jnp.float32, -bound, bound)
    return w, b


if __name__ == "__main__":
    d_model = 32
    n_heads = 4
    B, QL, KL = 2, 16, 16

    root = jax.random.PRNGKey(0)
    kq, kk, kv_, ko, kx1, kx2, kx3 = jax.random.split(root, 7)

    wq, bq = _init_linear(kq, d_model, d_model)
    wk, bk = _init_linear(kk, d_model, d_model)
    wv, bv = _init_linear(kv_, d_model, d_model)
    wo, bo = _init_linear(ko, d_model, d_model)
    params = (wq, bq, wk, bk, wv, bv, wo, bo)

    query = jax.random.normal(kx1, (B, QL, d_model), jnp.float32)
    key_in = jax.random.normal(kx2, (B, KL, d_model), jnp.float32)
    value = jax.random.normal(kx3, (B, KL, d_model), jnp.float32)

    # Small block sizes so the demo exercises multiple q-tiles, multiple heads
    # and multiple flash K-steps despite the tiny shapes.
    out = attention_layer(query, key_in, value, params, n_heads=n_heads,
                          block_q=8, block_k=8)
    out = jax.block_until_ready(out)

    ref = _reference(query, key_in, value, params, n_heads=n_heads)
    assert out.shape == (B, QL, d_model)
    # bf16 MXU operands (f32 accumulation / f32 softmax) vs an all-f32
    # reference: tolerance relaxed accordingly.
    assert jnp.allclose(out, ref, atol=3e-2, rtol=3e-2), (
        "mismatch vs reference; max abs err = "
        f"{float(jnp.max(jnp.abs(out - ref))):.3e}")

    print("KERNEL_OK")
</pallas_src>

<mosaic_0001>
module attributes {stable_mosaic.version = 11 : i64} {
  func.func @_flash_attention_kernel(%arg0: i32, %arg1: i32, %arg2: i32, %arg3: i32, %arg4: memref<1x1x8x8xbf16, #tpu.memory_space<vmem>>, %arg5: memref<1x1x8x8xbf16, #tpu.memory_space<vmem>>, %arg6: memref<1x1x8x8xbf16, #tpu.memory_space<vmem>>, %arg7: memref<4x8x32xbf16, #tpu.memory_space<vmem>>, %arg8: memref<1x32xf32, #tpu.memory_space<vmem>>, %arg9: memref<1x8x32xf32, #tpu.memory_space<vmem>>, %arg10: memref<8x1xf32, #tpu.memory_space<vmem>>, %arg11: memref<8x1xf32, #tpu.memory_space<vmem>>, %arg12: memref<8x8xf32, #tpu.memory_space<vmem>>, %arg13: memref<8x32xf32, #tpu.memory_space<vmem>>) attributes {dimension_semantics = [#tpu.dimension_semantics<parallel>, #tpu.dimension_semantics<parallel>, #tpu.dimension_semantics<arbitrary>, #tpu.dimension_semantics<arbitrary>], iteration_bounds = array<i64: 2, 2, 4, 2>, scalar_prefetch = 0 : i64, scratch_operands = 4 : i64, tpu.core_type = #tpu.core_type<tc>, window_params = [{transform_indices = @transform_0, window_bounds = array<i64: 1, 1, 8, 8>}, {transform_indices = @transform_1, window_bounds = array<i64: 1, 1, 8, 8>}, {transform_indices = @transform_2, window_bounds = array<i64: 1, 1, 8, 8>}, {pipeline_mode = #tpu.pipeline_mode<synchronous>, transform_indices = @transform_3, window_bounds = array<i64: 4, 8, 32>}, {pipeline_mode = #tpu.pipeline_mode<synchronous>, transform_indices = @transform_4, window_bounds = array<i64: 1, 32>}, {transform_indices = @transform_5, window_bounds = array<i64: 1, 8, 32>}]} {
    %c0_i32 = arith.constant 0 : i32
    %0 = arith.cmpi eq, %arg2, %c0_i32 : i32
    %c0_i32_0 = arith.constant 0 : i32
    %1 = arith.cmpi eq, %arg3, %c0_i32_0 : i32
    %2 = arith.andi %0, %1 : i1
    %3 = arith.extui %2 : i1 to i32
    %c0_i32_1 = arith.constant 0 : i32
    %4 = arith.cmpi ne, %3, %c0_i32_1 : i32
    scf.if %4 {
      %cst_33 = arith.constant 0.000000e+00 : f32
      %46 = vector.broadcast %cst_33 : f32 to vector<8x32xf32>
      %c0_34 = arith.constant 0 : index
      %c0_35 = arith.constant 0 : index
      %47 = vector.load %arg13[%c0_34, %c0_35] : memref<8x32xf32, #tpu.memory_space<vmem>>, vector<8x32xf32>
      tpu.vector_store %arg13[%c0_34, %c0_35], %46 {strides = array<i32>} : memref<8x32xf32, #tpu.memory_space<vmem>>, vector<8x32xf32>,
    } else {
    }
    %c0_i32_2 = arith.constant 0 : i32
    %5 = arith.cmpi eq, %arg3, %c0_i32_2 : i32
    %6 = arith.extui %5 : i1 to i32
    %c0_i32_3 = arith.constant 0 : i32
    %7 = arith.cmpi ne, %6, %c0_i32_3 : i32
    scf.if %7 {
      %cst_33 = arith.constant 0xFF800000 : f32
      %46 = vector.broadcast %cst_33 : f32 to vector<8x1xf32>
      %c0_34 = arith.constant 0 : index
      %c0_35 = arith.constant 0 : index
      %47 = vector.load %arg10[%c0_34, %c0_35] : memref<8x1xf32, #tpu.memory_space<vmem>>, vector<8x1xf32>
      tpu.vector_store %arg10[%c0_34, %c0_35], %46 {strides = array<i32>} : memref<8x1xf32, #tpu.memory_space<vmem>>, vector<8x1xf32>,
      %cst_36 = arith.constant 0.000000e+00 : f32
      %48 = vector.broadcast %cst_36 : f32 to vector<8x1xf32>
      %c0_37 = arith.constant 0 : index
      %c0_38 = arith.constant 0 : index
      %49 = vector.load %arg11[%c0_37, %c0_38] : memref<8x1xf32, #tpu.memory_space<vmem>>, vector<8x1xf32>
      tpu.vector_store %arg11[%c0_37, %c0_38], %48 {strides = array<i32>} : memref<8x1xf32, #tpu.memory_space<vmem>>, vector<8x1xf32>,
      %cst_39 = arith.constant 0.000000e+00 : f32
      %50 = vector.broadcast %cst_39 : f32 to vector<8x8xf32>
      %c0_40 = arith.constant 0 : index
      %c0_41 = arith.constant 0 : index
      %51 = vector.load %arg12[%c0_40, %c0_41] : memref<8x8xf32, #tpu.memory_space<vmem>>, vector<8x8xf32>
      tpu.vector_store %arg12[%c0_40, %c0_41], %50 {strides = array<i32>} : memref<8x8xf32, #tpu.memory_space<vmem>>, vector<8x8xf32>,
    } else {
    }
    %c0 = arith.constant 0 : index
    %c0_4 = arith.constant 0 : index
    %c0_5 = arith.constant 0 : index
    %c0_6 = arith.constant 0 : index
    %8 = vector.load %arg4[%c0, %c0_4, %c0_5, %c0_6] : memref<1x1x8x8xbf16, #tpu.memory_space<vmem>>, vector<1x1x8x8xbf16>
    %9 = vector.shape_cast %8 : vector<1x1x8x8xbf16> to vector<8x8xbf16>
    %c0_7 = arith.constant 0 : index
    %c0_8 = arith.constant 0 : index
    %c0_9 = arith.constant 0 : index
    %c0_10 = arith.constant 0 : index
    %10 = vector.load %arg5[%c0_7, %c0_8, %c0_9, %c0_10] : memref<1x1x8x8xbf16, #tpu.memory_space<vmem>>, vector<1x1x8x8xbf16>
    %11 = vector.shape_cast %10 : vector<1x1x8x8xbf16> to vector<8x8xbf16>
    %c0_11 = arith.constant 0 : index
    %c0_12 = arith.constant 0 : index
    %c0_13 = arith.constant 0 : index
    %c0_14 = arith.constant 0 : index
    %12 = vector.load %arg6[%c0_11, %c0_12, %c0_13, %c0_14] : memref<1x1x8x8xbf16, #tpu.memory_space<vmem>>, vector<1x1x8x8xbf16>
    %13 = vector.shape_cast %12 : vector<1x1x8x8xbf16> to vector<8x8xbf16>
    %cst = arith.constant dense<0.000000e+00> : vector<8x8xf32>
    %14 = tpu.matmul %9, %11, %cst {dimension_numbers = #tpu.dot_dimension_numbers<[1], [1], [0], [0], [0, 0, 1, 0], [], []>} : vector<8x8xbf16>, vector<8x8xbf16>, vector<8x8xf32> -> vector<8x8xf32>
    %c0_15 = arith.constant 0 : index
    %c0_16 = arith.constant 0 : index
    %15 = vector.load %arg10[%c0_15, %c0_16] : memref<8x1xf32, #tpu.memory_space<vmem>>, vector<8x1xf32>
    %cst_17 = arith.constant dense<0xFF800000> : vector<8xf32>
    %16 = vector.multi_reduction <maximumf>, %14, %cst_17 [1] : vector<8x8xf32> to vector<8xf32>
    %17 = vector.shape_cast %16 : vector<8xf32> to vector<8x1xf32>
    %18 = arith.maximumf %15, %17 : vector<8x1xf32>
    %19 = arith.subf %15, %18 : vector<8x1xf32>
    %20 = math.exp %19 : vector<8x1xf32>
    %21 = vector.broadcast %18 : vector<8x1xf32> to vector<8x8xf32>
    %22 = arith.subf %14, %21 : vector<8x8xf32>
    %23 = math.exp %22 : vector<8x8xf32>
    %c0_18 = arith.constant 0 : index
    %c0_19 = arith.constant 0 : index
    %24 = vector.load %arg11[%c0_18, %c0_19] : memref<8x1xf32, #tpu.memory_space<vmem>>, vector<8x1xf32>
    %25 = arith.mulf %20, %24 : vector<8x1xf32>
    %cst_20 = arith.constant dense<0.000000e+00> : vector<8xf32>
    %26 = vector.multi_reduction <add>, %23, %cst_20 [1] : vector<8x8xf32> to vector<8xf32>
    %27 = vector.shape_cast %26 : vector<8xf32> to vector<8x1xf32>
    %28 = arith.addf %25, %27 : vector<8x1xf32>
    %c0_21 = arith.constant 0 : index
    %c0_22 = arith.constant 0 : index
    %29 = vector.load %arg11[%c0_21, %c0_22] : memref<8x1xf32, #tpu.memory_space<vmem>>, vector<8x1xf32>
    tpu.vector_store %arg11[%c0_21, %c0_22], %28 {strides = array<i32>} : memref<8x1xf32, #tpu.memory_space<vmem>>, vector<8x1xf32>,
    %c0_23 = arith.constant 0 : index
    %c0_24 = arith.constant 0 : index
    %30 = vector.load %arg12[%c0_23, %c0_24] : memref<8x8xf32, #tpu.memory_space<vmem>>, vector<8x8xf32>
    %31 = vector.broadcast %20 : vector<8x1xf32> to vector<8x8xf32>
    %32 = arith.mulf %31, %30 : vector<8x8xf32>
    %33 = arith.truncf %23 : vector<8x8xf32> to vector<8x8xbf16>
    %cst_25 = arith.constant dense<0.000000e+00> : vector<8x8xf32>
    %34 = tpu.matmul %33, %13, %cst_25 {dimension_numbers = #tpu.dot_dimension_numbers<[1], [0], [0], [1], [0, 0, 1, 1], [], []>} : vector<8x8xbf16>, vector<8x8xbf16>, vector<8x8xf32> -> vector<8x8xf32>
    %35 = arith.addf %32, %34 : vector<8x8xf32>
    %c0_26 = arith.constant 0 : index
    %c0_27 = arith.constant 0 : index
    %36 = vector.load %arg12[%c0_26, %c0_27] : memref<8x8xf32, #tpu.memory_space<vmem>>, vector<8x8xf32>
    tpu.vector_store %arg12[%c0_26, %c0_27], %35 {strides = array<i32>} : memref<8x8xf32, #tpu.memory_space<vmem>>, vector<8x8xf32>,
    %c0_28 = arith.constant 0 : index
    %c0_29 = arith.constant 0 : index
    %37 = vector.load %arg10[%c0_28, %c0_29] : memref<8x1xf32, #tpu.memory_space<vmem>>, vector<8x1xf32>
    tpu.vector_store %arg10[%c0_28, %c0_29], %18 {strides = array<i32>} : memref<8x1xf32, #tpu.memory_space<vmem>>, vector<8x1xf32>,
    %c1_i32 = arith.constant 1 : i32
    %38 = arith.cmpi eq, %arg3, %c1_i32 : i32
    %39 = arith.extui %38 : i1 to i32
    %c0_i32_30 = arith.constant 0 : i32
    %40 = arith.cmpi ne, %39, %c0_i32_30 : i32
    scf.if %40 {
      %c0_33 = arith.constant 0 : index
      %c0_34 = arith.constant 0 : index
      %46 = vector.load %arg11[%c0_33, %c0_34] : memref<8x1xf32, #tpu.memory_space<vmem>>, vector<8x1xf32>
      %47 = tpu.reciprocal %46 {approx = true} : vector<8x1xf32> -> vector<8x1xf32>
      %c0_35 = arith.constant 0 : index
      %c0_36 = arith.constant 0 : index
      %48 = vector.load %arg12[%c0_35, %c0_36] : memref<8x8xf32, #tpu.memory_space<vmem>>, vector<8x8xf32>
      %49 = vector.broadcast %47 : vector<8x1xf32> to vector<8x8xf32>
      %50 = arith.mulf %48, %49 : vector<8x8xf32>
      %51 = arith.truncf %50 : vector<8x8xf32> to vector<8x8xbf16>
      %c0_37 = arith.constant 0 : index
      %c0_38 = arith.constant 0 : index
      %52 = vector.load %arg13[%c0_37, %c0_38] : memref<8x32xf32, #tpu.memory_space<vmem>>, vector<8x32xf32>
      %53 = arith.index_cast %arg2 : i32 to index
      %c0_39 = arith.constant 0 : index
      %c0_40 = arith.constant 0 : index
      %54 = vector.load %arg7[%53, %c0_39, %c0_40] : memref<4x8x32xbf16, #tpu.memory_space<vmem>>, vector<1x8x32xbf16>
      %55 = vector.shape_cast %54 : vector<1x8x32xbf16> to vector<8x32xbf16>
      %cst_41 = arith.constant dense<0.000000e+00> : vector<8x32xf32>
      %56 = tpu.matmul %51, %55, %cst_41 {dimension_numbers = #tpu.dot_dimension_numbers<[1], [0], [0], [1], [0, 0, 1, 1], [], []>} : vector<8x8xbf16>, vector<8x32xbf16>, vector<8x32xf32> -> vector<8x32xf32>
      %57 = arith.addf %52, %56 : vector<8x32xf32>
      %c0_42 = arith.constant 0 : index
      %c0_43 = arith.constant 0 : index
      %58 = vector.load %arg13[%c0_42, %c0_43] : memref<8x32xf32, #tpu.memory_space<vmem>>, vector<8x32xf32>
      tpu.vector_store %arg13[%c0_42, %c0_43], %57 {strides = array<i32>} : memref<8x32xf32, #tpu.memory_space<vmem>>, vector<8x32xf32>,
    } else {
    }
    %c3_i32 = arith.constant 3 : i32
    %41 = arith.cmpi eq, %arg2, %c3_i32 : i32
    %c1_i32_31 = arith.constant 1 : i32
    %42 = arith.cmpi eq, %arg3, %c1_i32_31 : i32
    %43 = arith.andi %41, %42 : i1
    %44 = arith.extui %43 : i1 to i32
    %c0_i32_32 = arith.constant 0 : i32
    %45 = arith.cmpi ne, %44, %c0_i32_32 : i32
    scf.if %45 {
      %c0_33 = arith.constant 0 : index
      %c0_34 = arith.constant 0 : index
      %46 = vector.load %arg13[%c0_33, %c0_34] : memref<8x32xf32, #tpu.memory_space<vmem>>, vector<8x32xf32>
      %c0_35 = arith.constant 0 : index
      %c0_36 = arith.constant 0 : index
      %47 = vector.load %arg8[%c0_35, %c0_36] : memref<1x32xf32, #tpu.memory_space<vmem>>, vector<1x32xf32>
      %48 = vector.broadcast %47 : vector<1x32xf32> to vector<8x32xf32>
      %49 = arith.addf %46, %48 : vector<8x32xf32>
      %c0_37 = arith.constant 0 : index
      %c0_38 = arith.constant 0 : index
      %c0_39 = arith.constant 0 : index
      %50 = vector.load %arg9[%c0_37, %c0_38, %c0_39] : memref<1x8x32xf32, #tpu.memory_space<vmem>>, vector<1x8x32xf32>
      %51 = vector.shape_cast %50 : vector<1x8x32xf32> to vector<8x32xf32>
      %52 = vector.shape_cast %49 : vector<8x32xf32> to vector<1x8x32xf32>
      tpu.vector_store %arg9[%c0_37, %c0_38, %c0_39], %52 {strides = array<i32>} : memref<1x8x32xf32, #tpu.memory_space<vmem>>, vector<1x8x32xf32>,
    } else {
    }
    return
  }
  func.func @transform_0(%arg0: i32, %arg1: i32, %arg2: i32, %arg3: i32) -> (i32, i32, i32, i32) {
    %c0_i32 = arith.constant 0 : i32
    %c0_i32_0 = arith.constant 0 : i32
    return %arg0, %arg2, %arg1, %c0_i32 : i32, i32, i32, i32
  }
  func.func @transform_1(%arg0: i32, %arg1: i32, %arg2: i32, %arg3: i32) -> (i32, i32, i32, i32) {
    %c0_i32 = arith.constant 0 : i32
    %c0_i32_0 = arith.constant 0 : i32
    return %arg0, %arg2, %arg3, %c0_i32 : i32, i32, i32, i32
  }
  func.func @transform_2(%arg0: i32, %arg1: i32, %arg2: i32, %arg3: i32) -> (i32, i32, i32, i32) {
    %c0_i32 = arith.constant 0 : i32
    %c0_i32_0 = arith.constant 0 : i32
    return %arg0, %arg2, %arg3, %c0_i32 : i32, i32, i32, i32
  }
  func.func @transform_3(%arg0: i32, %arg1: i32, %arg2: i32, %arg3: i32) -> (i32, i32, i32) {
    %c0_i32 = arith.constant 0 : i32
    %c0_i32_0 = arith.constant 0 : i32
    %c0_i32_1 = arith.constant 0 : i32
    %c0_i32_2 = arith.constant 0 : i32
    return %c0_i32, %c0_i32_0, %c0_i32_1 : i32, i32, i32
  }
  func.func @transform_4(%arg0: i32, %arg1: i32, %arg2: i32, %arg3: i32) -> (i32, i32) {
    %c0_i32 = arith.constant 0 : i32
    %c0_i32_0 = arith.constant 0 : i32
    %c0_i32_1 = arith.constant 0 : i32
    return %c0_i32, %c0_i32_0 : i32, i32
  }
  func.func @transform_5(%arg0: i32, %arg1: i32, %arg2: i32, %arg3: i32) -> (i32, i32, i32) {
    %c0_i32 = arith.constant 0 : i32
    %c0_i32_0 = arith.constant 0 : i32
    return %arg0, %arg1, %c0_i32 : i32, i32, i32
  }
}

module attributes {stable_mosaic.version = 11 : i64} {
  func.func @_flash_attention_kernel(%arg0: i32, %arg1: i32, %arg2: i32, %arg3: i32, %arg4: memref<1x1x8x8xbf16, #tpu.memory_space<vmem>>, %arg5: memref<1x1x8x8xbf16, #tpu.memory_space<vmem>>, %arg6: memref<1x1x8x8xbf16, #tpu.memory_space<vmem>>, %arg7: memref<4x8x32xbf16, #tpu.memory_space<vmem>>, %arg8: memref<1x32xf32, #tpu.memory_space<vmem>>, %arg9: memref<1x8x32xf32, #tpu.memory_space<vmem>>, %arg10: memref<8x1xf32, #tpu.memory_space<vmem>>, %arg11: memref<8x1xf32, #tpu.memory_space<vmem>>, %arg12: memref<8x8xf32, #tpu.memory_space<vmem>>, %arg13: memref<8x32xf32, #tpu.memory_space<vmem>>) attributes {dimension_semantics = [#tpu.dimension_semantics<parallel>, #tpu.dimension_semantics<parallel>, #tpu.dimension_semantics<arbitrary>, #tpu.dimension_semantics<arbitrary>], iteration_bounds = array<i64: 2, 2, 4, 2>, scalar_prefetch = 0 : i64, scratch_operands = 4 : i64, tpu.core_type = #tpu.core_type<tc>, window_params = [{transform_indices = @transform_0, window_bounds = array<i64: 1, 1, 8, 8>}, {transform_indices = @transform_1, window_bounds = array<i64: 1, 1, 8, 8>}, {transform_indices = @transform_2, window_bounds = array<i64: 1, 1, 8, 8>}, {pipeline_mode = #tpu.pipeline_mode<synchronous>, transform_indices = @transform_3, window_bounds = array<i64: 4, 8, 32>}, {pipeline_mode = #tpu.pipeline_mode<synchronous>, transform_indices = @transform_4, window_bounds = array<i64: 1, 32>}, {transform_indices = @transform_5, window_bounds = array<i64: 1, 8, 32>}]} {
    %c0_i32 = arith.constant 0 : i32
    %0 = arith.cmpi eq, %arg2, %c0_i32 : i32
    %c0_i32_0 = arith.constant 0 : i32
    %1 = arith.cmpi eq, %arg3, %c0_i32_0 : i32
    %2 = arith.andi %0, %1 : i1
    %3 = arith.extui %2 : i1 to i32
    %c0_i32_1 = arith.constant 0 : i32
    %4 = arith.cmpi ne, %3, %c0_i32_1 : i32
    scf.if %4 {
      %cst_33 = arith.constant 0.000000e+00 : f32
      %46 = vector.broadcast %cst_33 : f32 to vector<8x32xf32>
      %c0_34 = arith.constant 0 : index
      %c0_35 = arith.constant 0 : index
      %47 = vector.load %arg13[%c0_34, %c0_35] : memref<8x32xf32, #tpu.memory_space<vmem>>, vector<8x32xf32>
      tpu.vector_store %arg13[%c0_34, %c0_35], %46 {strides = array<i32>} : memref<8x32xf32, #tpu.memory_space<vmem>>, vector<8x32xf32>,
    } else {
    }
    %c0_i32_2 = arith.constant 0 : i32
    %5 = arith.cmpi eq, %arg3, %c0_i32_2 : i32
    %6 = arith.extui %5 : i1 to i32
    %c0_i32_3 = arith.constant 0 : i32
    %7 = arith.cmpi ne, %6, %c0_i32_3 : i32
    scf.if %7 {
      %cst_33 = arith.constant 0xFF800000 : f32
      %46 = vector.broadcast %cst_33 : f32 to vector<8x1xf32>
      %c0_34 = arith.constant 0 : index
      %c0_35 = arith.constant 0 : index
      %47 = vector.load %arg10[%c0_34, %c0_35] : memref<8x1xf32, #tpu.memory_space<vmem>>, vector<8x1xf32>
      tpu.vector_store %arg10[%c0_34, %c0_35], %46 {strides = array<i32>} : memref<8x1xf32, #tpu.memory_space<vmem>>, vector<8x1xf32>,
      %cst_36 = arith.constant 0.000000e+00 : f32
      %48 = vector.broadcast %cst_36 : f32 to vector<8x1xf32>
      %c0_37 = arith.constant 0 : index
      %c0_38 = arith.constant 0 : index
      %49 = vector.load %arg11[%c0_37, %c0_38] : memref<8x1xf32, #tpu.memory_space<vmem>>, vector<8x1xf32>
      tpu.vector_store %arg11[%c0_37, %c0_38], %48 {strides = array<i32>} : memref<8x1xf32, #tpu.memory_space<vmem>>, vector<8x1xf32>,
      %cst_39 = arith.constant 0.000000e+00 : f32
      %50 = vector.broadcast %cst_39 : f32 to vector<8x8xf32>
      %c0_40 = arith.constant 0 : index
      %c0_41 = arith.constant 0 : index
      %51 = vector.load %arg12[%c0_40, %c0_41] : memref<8x8xf32, #tpu.memory_space<vmem>>, vector<8x8xf32>
      tpu.vector_store %arg12[%c0_40, %c0_41], %50 {strides = array<i32>} : memref<8x8xf32, #tpu.memory_space<vmem>>, vector<8x8xf32>,
    } else {
    }
    %c0 = arith.constant 0 : index
    %c0_4 = arith.constant 0 : index
    %c0_5 = arith.constant 0 : index
    %c0_6 = arith.constant 0 : index
    %8 = vector.load %arg4[%c0, %c0_4, %c0_5, %c0_6] : memref<1x1x8x8xbf16, #tpu.memory_space<vmem>>, vector<1x1x8x8xbf16>
    %9 = vector.shape_cast %8 : vector<1x1x8x8xbf16> to vector<8x8xbf16>
    %c0_7 = arith.constant 0 : index
    %c0_8 = arith.constant 0 : index
    %c0_9 = arith.constant 0 : index
    %c0_10 = arith.constant 0 : index
    %10 = vector.load %arg5[%c0_7, %c0_8, %c0_9, %c0_10] : memref<1x1x8x8xbf16, #tpu.memory_space<vmem>>, vector<1x1x8x8xbf16>
    %11 = vector.shape_cast %10 : vector<1x1x8x8xbf16> to vector<8x8xbf16>
    %c0_11 = arith.constant 0 : index
    %c0_12 = arith.constant 0 : index
    %c0_13 = arith.constant 0 : index
    %c0_14 = arith.constant 0 : index
    %12 = vector.load %arg6[%c0_11, %c0_12, %c0_13, %c0_14] : memref<1x1x8x8xbf16, #tpu.memory_space<vmem>>, vector<1x1x8x8xbf16>
    %13 = vector.shape_cast %12 : vector<1x1x8x8xbf16> to vector<8x8xbf16>
    %cst = arith.constant dense<0.000000e+00> : vector<8x8xf32>
    %14 = tpu.matmul %9, %11, %cst {dimension_numbers = #tpu.dot_dimension_numbers<[1], [1], [0], [0], [0, 0, 1, 0], [], []>} : vector<8x8xbf16>, vector<8x8xbf16>, vector<8x8xf32> -> vector<8x8xf32>
    %c0_15 = arith.constant 0 : index
    %c0_16 = arith.constant 0 : index
    %15 = vector.load %arg10[%c0_15, %c0_16] : memref<8x1xf32, #tpu.memory_space<vmem>>, vector<8x1xf32>
    %cst_17 = arith.constant dense<0xFF800000> : vector<8xf32>
    %16 = vector.multi_reduction <maximumf>, %14, %cst_17 [1] : vector<8x8xf32> to vector<8xf32>
    %17 = vector.shape_cast %16 : vector<8xf32> to vector<8x1xf32>
    %18 = arith.maximumf %15, %17 : vector<8x1xf32>
    %19 = arith.subf %15, %18 : vector<8x1xf32>
    %20 = math.exp %19 : vector<8x1xf32>
    %21 = vector.broadcast %18 : vector<8x1xf32> to vector<8x8xf32>
    %22 = arith.subf %14, %21 : vector<8x8xf32>
    %23 = math.exp %22 : vector<8x8xf32>
    %c0_18 = arith.constant 0 : index
    %c0_19 = arith.constant 0 : index
    %24 = vector.load %arg11[%c0_18, %c0_19] : memref<8x1xf32, #tpu.memory_space<vmem>>, vector<8x1xf32>
    %25 = arith.mulf %20, %24 : vector<8x1xf32>
    %cst_20 = arith.constant dense<0.000000e+00> : vector<8xf32>
    %26 = vector.multi_reduction <add>, %23, %cst_20 [1] : vector<8x8xf32> to vector<8xf32>
    %27 = vector.shape_cast %26 : vector<8xf32> to vector<8x1xf32>
    %28 = arith.addf %25, %27 : vector<8x1xf32>
    %c0_21 = arith.constant 0 : index
    %c0_22 = arith.constant 0 : index
    %29 = vector.load %arg11[%c0_21, %c0_22] : memref<8x1xf32, #tpu.memory_space<vmem>>, vector<8x1xf32>
    tpu.vector_store %arg11[%c0_21, %c0_22], %28 {strides = array<i32>} : memref<8x1xf32, #tpu.memory_space<vmem>>, vector<8x1xf32>,
    %c0_23 = arith.constant 0 : index
    %c0_24 = arith.constant 0 : index
    %30 = vector.load %arg12[%c0_23, %c0_24] : memref<8x8xf32, #tpu.memory_space<vmem>>, vector<8x8xf32>
    %31 = vector.broadcast %20 : vector<8x1xf32> to vector<8x8xf32>
    %32 = arith.mulf %31, %30 : vector<8x8xf32>
    %33 = arith.truncf %23 : vector<8x8xf32> to vector<8x8xbf16>
    %cst_25 = arith.constant dense<0.000000e+00> : vector<8x8xf32>
    %34 = tpu.matmul %33, %13, %cst_25 {dimension_numbers = #tpu.dot_dimension_numbers<[1], [0], [0], [1], [0, 0, 1, 1], [], []>} : vector<8x8xbf16>, vector<8x8xbf16>, vector<8x8xf32> -> vector<8x8xf32>
    %35 = arith.addf %32, %34 : vector<8x8xf32>
    %c0_26 = arith.constant 0 : index
    %c0_27 = arith.constant 0 : index
    %36 = vector.load %arg12[%c0_26, %c0_27] : memref<8x8xf32, #tpu.memory_space<vmem>>, vector<8x8xf32>
    tpu.vector_store %arg12[%c0_26, %c0_27], %35 {strides = array<i32>} : memref<8x8xf32, #tpu.memory_space<vmem>>, vector<8x8xf32>,
    %c0_28 = arith.constant 0 : index
    %c0_29 = arith.constant 0 : index
    %37 = vector.load %arg10[%c0_28, %c0_29] : memref<8x1xf32, #tpu.memory_space<vmem>>, vector<8x1xf32>
    tpu.vector_store %arg10[%c0_28, %c0_29], %18 {strides = array<i32>} : memref<8x1xf32, #tpu.memory_space<vmem>>, vector<8x1xf32>,
    %c1_i32 = arith.constant 1 : i32
    %38 = arith.cmpi eq, %arg3, %c1_i32 : i32
    %39 = arith.extui %38 : i1 to i32
    %c0_i32_30 = arith.constant 0 : i32
    %40 = arith.cmpi ne, %39, %c0_i32_30 : i32
    scf.if %40 {
      %c0_33 = arith.constant 0 : index
      %c0_34 = arith.constant 0 : index
      %46 = vector.load %arg11[%c0_33, %c0_34] : memref<8x1xf32, #tpu.memory_space<vmem>>, vector<8x1xf32>
      %47 = tpu.reciprocal %46 {approx = true} : vector<8x1xf32> -> vector<8x1xf32>
      %c0_35 = arith.constant 0 : index
      %c0_36 = arith.constant 0 : index
      %48 = vector.load %arg12[%c0_35, %c0_36] : memref<8x8xf32, #tpu.memory_space<vmem>>, vector<8x8xf32>
      %49 = vector.broadcast %47 : vector<8x1xf32> to vector<8x8xf32>
      %50 = arith.mulf %48, %49 : vector<8x8xf32>
      %51 = arith.truncf %50 : vector<8x8xf32> to vector<8x8xbf16>
      %c0_37 = arith.constant 0 : index
      %c0_38 = arith.constant 0 : index
      %52 = vector.load %arg13[%c0_37, %c0_38] : memref<8x32xf32, #tpu.memory_space<vmem>>, vector<8x32xf32>
      %53 = arith.index_cast %arg2 : i32 to index
      %c0_39 = arith.constant 0 : index
      %c0_40 = arith.constant 0 : index
      %54 = vector.load %arg7[%53, %c0_39, %c0_40] : memref<4x8x32xbf16, #tpu.memory_space<vmem>>, vector<1x8x32xbf16>
      %55 = vector.shape_cast %54 : vector<1x8x32xbf16> to vector<8x32xbf16>
      %cst_41 = arith.constant dense<0.000000e+00> : vector<8x32xf32>
      %56 = tpu.matmul %51, %55, %cst_41 {dimension_numbers = #tpu.dot_dimension_numbers<[1], [0], [0], [1], [0, 0, 1, 1], [], []>} : vector<8x8xbf16>, vector<8x32xbf16>, vector<8x32xf32> -> vector<8x32xf32>
      %57 = arith.addf %52, %56 : vector<8x32xf32>
      %c0_42 = arith.constant 0 : index
      %c0_43 = arith.constant 0 : index
      %58 = vector.load %arg13[%c0_42, %c0_43] : memref<8x32xf32, #tpu.memory_space<vmem>>, vector<8x32xf32>
      tpu.vector_store %arg13[%c0_42, %c0_43], %57 {strides = array<i32>} : memref<8x32xf32, #tpu.memory_space<vmem>>, vector<8x32xf32>,
    } else {
    }
    %c3_i32 = arith.constant 3 : i32
    %41 = arith.cmpi eq, %arg2, %c3_i32 : i32
    %c1_i32_31 = arith.constant 1 : i32
    %42 = arith.cmpi eq, %arg3, %c1_i32_31 : i32
    %43 = arith.andi %41, %42 : i1
    %44 = arith.extui %43 : i1 to i32
    %c0_i32_32 = arith.constant 0 : i32
    %45 = arith.cmpi ne, %44, %c0_i32_32 : i32
    scf.if %45 {
      %c0_33 = arith.constant 0 : index
      %c0_34 = arith.constant 0 : index
      %46 = vector.load %arg13[%c0_33, %c0_34] : memref<8x32xf32, #tpu.memory_space<vmem>>, vector<8x32xf32>
      %c0_35 = arith.constant 0 : index
      %c0_36 = arith.constant 0 : index
      %47 = vector.load %arg8[%c0_35, %c0_36] : memref<1x32xf32, #tpu.memory_space<vmem>>, vector<1x32xf32>
      %48 = vector.broadcast %47 : vector<1x32xf32> to vector<8x32xf32>
      %49 = arith.addf %46, %48 : vector<8x32xf32>
      %c0_37 = arith.constant 0 : index
      %c0_38 = arith.constant 0 : index
      %c0_39 = arith.constant 0 : index
      %50 = vector.load %arg9[%c0_37, %c0_38, %c0_39] : memref<1x8x32xf32, #tpu.memory_space<vmem>>, vector<1x8x32xf32>
      %51 = vector.shape_cast %50 : vector<1x8x32xf32> to vector<8x32xf32>
      %52 = vector.shape_cast %49 : vector<8x32xf32> to vector<1x8x32xf32>
      tpu.vector_store %arg9[%c0_37, %c0_38, %c0_39], %52 {strides = array<i32>} : memref<1x8x32xf32, #tpu.memory_space<vmem>>, vector<1x8x32xf32>,
    } else {
    }
    return
  }
  func.func @transform_0(%arg0: i32, %arg1: i32, %arg2: i32, %arg3: i32) -> (i32, i32, i32, i32) {
    %c0_i32 = arith.constant 0 : i32
    %c0_i32_0 = arith.constant 0 : i32
    return %arg0, %arg2, %arg1, %c0_i32 : i32, i32, i32, i32
  }
  func.func @transform_1(%arg0: i32, %arg1: i32, %arg2: i32, %arg3: i32) -> (i32, i32, i32, i32) {
    %c0_i32 = arith.constant 0 : i32
    %c0_i32_0 = arith.constant 0 : i32
    return %arg0, %arg2, %arg3, %c0_i32 : i32, i32, i32, i32
  }
  func.func @transform_2(%arg0: i32, %arg1: i32, %arg2: i32, %arg3: i32) -> (i32, i32, i32, i32) {
    %c0_i32 = arith.constant 0 : i32
    %c0_i32_0 = arith.constant 0 : i32
    return %arg0, %arg2, %arg3, %c0_i32 : i32, i32, i32, i32
  }
  func.func @transform_3(%arg0: i32, %arg1: i32, %arg2: i32, %arg3: i32) -> (i32, i32, i32) {
    %c0_i32 = arith.constant 0 : i32
    %c0_i32_0 = arith.constant 0 : i32
    %c0_i32_1 = arith.constant 0 : i32
    %c0_i32_2 = arith.constant 0 : i32
    return %c0_i32, %c0_i32_0, %c0_i32_1 : i32, i32, i32
  }
  func.func @transform_4(%arg0: i32, %arg1: i32, %arg2: i32, %arg3: i32) -> (i32, i32) {
    %c0_i32 = arith.constant 0 : i32
    %c0_i32_0 = arith.constant 0 : i32
    %c0_i32_1 = arith.constant 0 : i32
    return %c0_i32, %c0_i32_0 : i32, i32
  }
  func.func @transform_5(%arg0: i32, %arg1: i32, %arg2: i32, %arg3: i32) -> (i32, i32, i32) {
    %c0_i32 = arith.constant 0 : i32
    %c0_i32_0 = arith.constant 0 : i32
    return %arg0, %arg1, %c0_i32 : i32, i32, i32
  }
}

</mosaic_0001>

<bundles_post_ra>
// kernel: tpu_custom_call.1
= control target key start
LH: loop header
LB: loop body
LE: loop exit
PB: predicated region body
PF: predicated region fallthrough
CT: control target
= control target key end

     0   :  { %10 = vsyncpa [#allocation7], 0  ;;  %s1315_s0 = inlined_call_operand.vmem [shape: bf16[2,4,16,8], index: 0, kind: input, shape index: {}]   ;;  %s1316_s1 = inlined_call_operand.vmem [shape: bf16[2,4,16,8], index: 1, kind: input, shape index: {}]   ;;  %s1317_s2 = inlined_call_operand.vmem [shape: bf16[2,4,16,8], index: 2, kind: input, shape index: {}]   ;;  %s1318_s3 = inlined_call_operand.vmem [shape: bf16[4,8,32], index: 3, kind: input, shape index: {}]   ;;  %s1319_s4 = inlined_call_operand.vmem [shape: f32[1,32], index: 4, kind: input, shape index: {}]   ;;  %s1320_s5 = inlined_call_operand.hbm [shape: f32[2,16,32], index: 5, kind: output, shape index: {}]  }
   0x1   :  { %12 = vsyncpa [#allocation7 + $0x1], 0  ;;  %s1098_s18 = smov 0   ;;  %s1100_s19 = smov 0  }
   0x2   :  { %s1102_s20 = smov 0   ;;  %s1104_s21 = smov 0  }
   0x3   :  { %s1106_s22 = smov 0   ;;  %s1108_s23 = smov 0  }
   0x4   :  { %s1110_s24 = smov 0   ;;  %s1112_s25 = smov 0  }
   0x5   :  { %s1114_s26 = smov 0   ;;  %s1116_s27 = smov 0  }
   0x6   :  { %s1118_s28 = smov 0   ;;  %s1120_s29 = smov 0  }
   0x7 LB: > { %1331 = sst [smem:[#allocation9_spill]] %s1012_s18  ;;  %s760_s30 = sadd.s32 4294967295, %s1056_s29   ;;  %s1056_s29 = sphi %s1120_s29, %s18_s29   ;;  %s1052_s28 = sphi %s1118_s28, %s1357_s28   ;;  %s1048_s27 = sphi %s1116_s27, %s1356_s27   ;;  %s1044_s26 = sphi %s1114_s26, %s1355_s26   ;;  %s1040_s25 = sphi %s1112_s25, %s1354_s25   ;;  %s1036_s24 = sphi %s1110_s24, %s1353_s24   ;;  %s1032_s23 = sphi %s1108_s23, %s1352_s23   ;;  %s1028_s22 = sphi %s1106_s22, %s1351_s22   ;;  %s1024_s21 = sphi %s1104_s21, %s1360_s21   ;;  %s1020_s20 = sphi %s1102_s20, %s1349_s20   ;;  %s1016_s19 = sphi %s1100_s19, %s1359_s19   ;;  %s1012_s18 = sphi %s1098_s18, %s1358_s18  }
   0x8   : > { %1332 = sst [smem:[#allocation10_spill]] %s1020_s20  ;;  %s761_s6 = sadd.s32 4294967294, %s1056_s29  }
   0x9   : > { %1333 = sst [smem:[#allocation11_spill]] %s1040_s25  ;;  %s33_s7 = sadd.s32 1, %s1040_s25 }
   0xa   : > { %1334 = sst [smem:[#allocation12_spill]] %s1044_s26  ;;  %p34_p0 = scmp.ge.s32.totalorder %s33_s7, 2 }
   0xb   : > { %1335 = sst [smem:[#allocation13_spill]] %s1048_s27  ;;  %s36_s8 = sadd.s32 1, %s1044_s26 }
   0xc   : > { %1336 = sst [smem:[#allocation14_spill]] %s1052_s28  ;;  %s40_s9 = sadd.s32 1, %s1048_s27 }
   0xd   : > { %s44_s10 = sadd.s32 1, %s1052_s28  ;;  %s1362_s7 = smov (%p34_p0, %s33_s7), 0 }
   0xe   : > { %1337 = sst [smem:[#allocation15_spill]] %s1362_s7  ;;  %s1364_s8 = smov (!%p34_p0, %s36_s8), %s1044_s26 }
   0xf   : > { %p195_p1 = scmp.ne.s32.totalorder %s1020_s20, %s1016_s19  ;;  %p196_p2 = scmp.eq.s32.totalorder %s760_s30, 31 }
  0x10   : > { %p38_p3 = scmp.ge.s32.totalorder %s1364_s8, 4  ;;  %p201_p4 = scmp.ne.s32.totalorder %s1016_s19, %s1012_s18 }
  0x11   : > { %p1171_p5 = por %p196_p2, %p195_p1  ;;  %p202_p6 = scmp.eq.s32.totalorder %s761_s6, 31 }
  0x12   : > { %s1366_s8 = smov (%p38_p3, %s1364_s8), 0  ;;  %s1368_s9 = smov (!%p38_p3, %s40_s9), %s1048_s27 }
  0x13   : > { %1339 = sst [smem:[#allocation16_spill]] %s1366_s8  ;;  %p1178_p7 = por %p202_p6, %p201_p4 }
  0x14   : > { %p764_p8 = scmp.ge.s32.totalorder %s1056_s29, 1  ;;  %p42_p9 = scmp.ge.s32.totalorder %s1368_s9, 2 }
  0x15   : > { %s1340_s12 = scalar_select %p1178_p7, 1, 0 }
  0x16   : > { %p271_p10 = scmp.lt.s32.totalorder %s1056_s29, 33  ;;  %s1370_s9 = smov (%p42_p9, %s1368_s9), 0 }
  0x17   : > { %1341 = sst [smem:[#allocation17_spill]] %s1340_s12  ;;  %s1372_s10 = smov (!%p42_p9, %s44_s10), %s1052_s28 }
  0x18   : > { %1342 = sst [smem:[#allocation18_spill]] %s1370_s9  ;;  %p272_p11 = pnand %p764_p8, %p271_p10 }
  0x19   : > { %p46_p12 = scmp.ge.s32.totalorder %s1372_s10, 2  ;;  %s181_s13 = ssub.s32 %s1048_s27, %s1370_s9 }
  0x1a   : > { %s185_s16 = sadd.s32 1, %s1020_s20  ;;  %s1326_s30 = sand.u32 (!%p272_p11), 1, %s1016_s19  }
  0x1b   : > { %s1374_s10 = smov (%p46_p12, %s1372_s10), 0  ;;  %p330_p0 = scmp.lt.s32.totalorder (!%p272_p11), %s1036_s24, 1 }
  0x1c   : > { %1343 = sst [smem:[#allocation19_spill]] %s1374_s10  ;;  %s180_s14 = ssub.s32 %s1052_s28, %s1374_s10 }
  0x1d   : > { %s182_s15 = sor.u32 %s181_s13, %s180_s14  ;;  %s1201_s6 = sshll.u32 (!%p272_p11), %s1326_s30, 3 }
  0x1e   : > { %p183_p13 = scmp.eq.s32.totalorder %s182_s15, 0  ;;  %275 = sbr.rel (%p272_p11) target bundleno = 1127 (0x467), region = 40 }
  0x1f   : > { %p332_p1 = scmp.lt.s32.totalorder (!%p272_p11), %s1028_s22, 3  ;;  %p334_p2 = scmp.lt.s32.totalorder (!%p272_p11), %s1032_s23, 1 }
  0x20   : > { %s1195_s17 = scalar_select %p183_p13, %s1020_s20, %s185_s16  }
  0x21   : > { %p346_p3 = scmp.lt.s32.totalorder (!%p272_p11), %s1024_s21, 1  ;;  %p367_p4 = scmp.eq.s32.totalorder (!%p272_p11), %s1028_s22, 0 }
  0x22   : > { %1344 = sst [smem:[#allocation20_spill]] %s1195_s17  ;;  %p368_p6 = scmp.eq.s32.totalorder (!%p272_p11), %s1024_s21, 0 }
  0x23   : > { %s331_s13 = scalar_select %p330_p0, %s1036_s24, 1 }
  0x24   : > { %s333_s14 = scalar_select %p332_p1, %s1028_s22, 3 }
  0x25   : > { %s335_s15 = scalar_select %p334_p2, %s1032_s23, 1 }
  0x26   : > { %s766_s16 = sshll.u32 %s333_s14, 1  ;;  %s767_s10 = sshll.u32 %s331_s13, 3 }
  0x27   : > { %s337_s9 = sadd.s32 %s766_s16, %s335_s15  ;;  %p369_p8 = pnand %p368_p6, %p367_p4 }
  0x28   : > { %s339_s8 = sadd.s32 %s767_s10, %s337_s9 }
  0x29   : > { %s768_s7 = sshll.u32 %s339_s8, 2  ;;  %s329_s8 = scalar_lea.vmem [#allocation6], %s1201_s6 }
  0x2a   : > { %s1214_s26 = scalar_lea.vmem %s1315_s0, %s768_s7 }
  0x2b   : > { %s347_s30 = scalar_select %p346_p3, %s1024_s21, 1 }
  0x2c   : > { %372 = sbr.rel (%p369_p8) target bundleno = 51 (0x33), region = 44 }
  0x2d   : > { %s349_s25 = sadd.s32 %s766_s16, %s347_s30 }
  0x2e   : > { %s351_s17 = sadd.s32 %s767_s10, %s349_s25 }
  0x2f   : > { %s771_s20 = sshll.u32 %s351_s17, 2 }
  0x30   : > { %s353_s13 = scalar_lea.vmem %s1316_s1, %s771_s20  ;;  %s1223_s9 = scalar_lea.vmem %s1317_s2, %s771_s20 }
  0x31   : > { %vm373_vm0 = vcmask 261120   ;;  %v1058_v0 = vmov 0.0  }
  0x32   : > { %374 = vst.msk [vmem:[#allocation5] sm:$0xff] %vm373_vm0, %v1058_v0 }
  0x33 PF: > { %p775_p9 = scmp.ne.s32.totalorder %s1024_s21, 0 }
  0x35   : > { %377 = sbr.rel (%p775_p9) target bundleno = 61 (0x3d), region = 48 }
  0x3a   : > { %vm378_vm1 = vcmask 7168   ;;  %vm381_vm2 = vcmask 64512   ;;  %v1059_v1 = vmov -inf   ;;  %v1060_v2 = vmov 0.0  }
  0x3b   : > { %379 = vst.msk [vmem:[#allocation2] sm:$0xff] %vm378_vm1, %v1059_v1  ;;  %380 = vst.msk [vmem:[#allocation3] sm:$0xff] %vm378_vm1, %v1060_v2 }
  0x3c   : > { %382 = vst.msk [vmem:[#allocation4] sm:$0xff] %vm381_vm2, %v1060_v2 }
  0x3d PF: > { %v384_v3 = vld [vmem:[%s353_s13] sm:$0xf]  ;;  %vm386_vm3 = vcmask 64512   ;;  %v1061_v4 = vmov 0.0   ;;  %vm1062_vm4 = vmmov 0   ;;  %v1063_v12 = vmov 0  }
  0x3e   : > { %793 = vmatprep.subr.bf16.mxu0 %v1061_v4  ;;  %v391_v5 = vsel %vm386_vm3, %v384_v3, 0  ;;  %795 = vmatprep.mubr.msk.bf16.mxu0 %vm1062_vm4, %v1061_v4  ;;  %v383_v6 = vld [vmem:[%s1214_s26] sm:$0xf]  ;;  %vm455_vm5 = vcmask 7168   ;;  %vm468_vm6 = vcmask 1043456   ;;  %p515_p10 = scmp.eq.s32.totalorder %s1024_s21, 1 }
  0x3f   : > { %794 = vmatpush3.bf16.xpose.msra.mxu0 %v391_v5  ;;  %799 = vmatprep.subr.bf16.mxu1 %v1061_v4  ;;  %v385_v17 = vld [vmem:[%s1223_s9] sm:$0xf]  ;;  %p778_p11 = scmp.ne.s32.totalorder %s1024_s21, 1 }
  0x40   : > { %801 = vmatprep.mubr.msk.bf16.mxu1 %vm1062_vm4, %v1061_v4  ;;  %923 = vset.pattern.permute.xlu0 %v1063_v12  ;;  %v470_v18 = vsel %vm468_vm6, %v385_v17, 0  ;;  %s779_s18 = sshll.u32 (!%p778_p11), %s1028_s22, 2 }
  0x41   : > { %924 = vset.pattern.permute.xlu1 %v1063_v12  ;;  %800 = vmatpush3.bf16.msra.mxu1 %v470_v18  ;;  %s531_s26 = scalar_lea.vmem (!%p778_p11), %s1318_s3, %s779_s18 }
  0x42   : > { %v433_v13 = vld [vmem:[#allocation2] sm:$0xff]  ;;  %v449_v27 = vld [vmem:[#allocation3] sm:$0xff] }
  0x43   : > { %v457_v31 = vld [vmem:[#allocation4] sm:$0xff] }
  0x46   : > { %796 = vmatmul.mubr.msk.bf16.vlgmr.msra.gmra.mxu0 %vm386_vm3, %v383_v6 }
 0x106   : > { %v427_v7 = vpop.f32.mrf.mxu0 }
 0x107   : > { %v434_v8 = vsel %vm386_vm3, %v427_v7, -inf }
 0x108   : > { %435 = vmax.xlane.f32.xlu0 %v434_v8  ;;  %v797_v9 = vpop.f32.mrf.mxu0 }
 0x10a   : > { %v430_v10 = vpop.f32.mrf.mxu0 }
 0x10c   : > { %v798_v11 = vpop.f32.mrf.mxu0 }
 0x191   : > { %v436_v14 = vpop.xlane.xlu0 %435 }
 0x192   : > { %v437_v15 = vmax.f32 %v433_v13, %v436_v14 }
 0x194   : > { %v438_v16 = vsub.f32 %v433_v13, %v437_v15  ;;  %514 = vst.msk [vmem:[#allocation2] sm:$0xff] %vm455_vm5, %v437_v15  ;;  %443 = vperm.xlu0 %923, %v437_v15  }
 0x196   : > { %v439_v23 = vmul.f32 1.442695, %v438_v16 }
 0x20f   : > { %v444_v19 = vpop.permute.xlu0 %443 }
 0x210   : > { %v446_v20 = vsub.f32 %v427_v7, %v444_v19 }
 0x212   : > { %v447_v21 = vmul.f32 1.442695, %v446_v20 }
 0x214   : > { %925 = vpow2.f32 %v447_v21 }
 0x215   : > { %927 = vpow2.f32 %v439_v23 }
 0x221   : > { %v926_v22 = vpop.eup %925 }
 0x222   : > { %v451_v24 = vsel %vm386_vm3, %v926_v22, 0.0  ;;  %v464_v25 = vpack.c.bf16 %v926_v22, %v926_v22  ;;  %v928_v26 = vpop.eup %927 }
 0x223   : > { %452 = vadd.xlane.f32.xlu1 %v451_v24  ;;  %v450_v28 = vmul.f32 %v928_v26, %v449_v27 }
 0x224   : > { %802 = vmatmul.mubr.msk.bf16.vlgmr.msra.gmra.mxu1 %vm386_vm3, %v464_v25 }
 0x234   : > { %460 = vperm.xlu1 %924, %v928_v26  }
 0x2ac   : > { %v453_v29 = vpop.xlane.xlu1 %452 }
 0x2ad   : > { %v454_v30 = vadd.f32 %v453_v29, %v450_v28 }
 0x2af   : > { %456 = vst.msk [vmem:[#allocation3] sm:$0xff] %vm455_vm5, %v454_v30 }
 0x2b0   : > { %v461_v32 = vpop.permute.xlu1 %460 }
 0x2b1   : > { %v463_v33 = vmul.f32 %v461_v32, %v457_v31 }
 0x2e4   : > { %v506_v34 = vpop.f32.mrf.mxu1 }
 0x2e5   : > { %v512_v35 = vadd.f32 %v506_v34, %v463_v33 }
 0x2e6   : > { %v803_v36 = vpop.f32.mrf.mxu1  ;;  %518 = sbr.rel (%p778_p11) target bundleno = 1089 (0x441), region = 52 }
 0x2e7   : > { %513 = vst.msk [vmem:[#allocation4] sm:$0xff] %vm386_vm3, %v512_v35 }
 0x2e8   : > { %v509_v37 = vpop.f32.mrf.mxu1 }
 0x2ea   : > { %v804_v38 = vpop.f32.mrf.mxu1 }
 0x2eb   : > { %v519_v39 = vld [vmem:[#allocation3] sm:$0xff]  ;;  %v1064_v40 = vmov 0   ;;  %v532_v41 = vld [vmem:[%s531_s26] sm:$0xf]  ;;  %v1065_v42 = vmov 0.0   ;;  %vm1066_vm7 = vmmov 0  }
 0x2ec   : > { %929 = vset.pattern.permute.xlu0 %v1064_v40  ;;  %930 = vrcp.f32 %v519_v39  ;;  %805 = vmatprep.subr.bf16.mxu0 %v1065_v42  ;;  %v537_v43 = vsel %vm468_vm6, %v532_v41, 0  ;;  %v529_v49 = vld [vmem:[#allocation5] sm:$0xff]  ;;  %vm580_vm8 = vcmask 261120  }
 0x2ed   : > { %806 = vmatpush3.bf16.msra.mxu0 %v537_v43  ;;  %807 = vmatprep.mubr.msk.bf16.mxu0 %vm1066_vm7, %v1065_v42 }
 0x2ee   : > { %v521_v45 = vld [vmem:[#allocation4] sm:$0xff] }
 0x2f9   : > { %v931_v44 = vpop.eup %930 }
 0x2fa   : > { %524 = vperm.xlu0 %929, %v931_v44  }
 0x375   : > { %v525_v46 = vpop.permute.xlu0 %524 }
 0x376   : > { %v527_v47 = vmul.f32 %v525_v46, %v521_v45 }
 0x378   : > { %v528_v48 = vpack.c.bf16 %v527_v47, %v527_v47 }
 0x37a   : > { %808 = vmatmul.mubr.msk.bf16.vlgmr.msra.gmra.mxu0 %vm386_vm3, %v528_v48 }
 0x43a   : > { %v573_v50 = vpop.f32.mrf.mxu0 }
 0x43b   : > { %v579_v51 = vadd.f32 %v573_v50, %v529_v49 }
 0x43c   : > { %v809_v52 = vpop.f32.mrf.mxu0 }
 0x43d   : > { %581 = vst.msk [vmem:[#allocation5] sm:$0xff] %vm580_vm8, %v579_v51 }
 0x43e   : > { %v576_v53 = vpop.f32.mrf.mxu0 }
 0x440   : > { %v810_v54 = vpop.f32.mrf.mxu0 }
 0x441 PF: > { %p582_p12 = scmp.eq.s32.totalorder %s1028_s22, 3 }
 0x443   : > { %p583_p13 = pnand %p582_p12, %p515_p10 }
 0x445   : > { %586 = sbr.rel (%p583_p13) target bundleno = 1102 (0x44e), region = 56 }
 0x44a   : > { %v587_v55 = vld [vmem:[#allocation5] sm:$0xff]  ;;  %v781_v56 = vld [vmem:[%s1319_s4] ss:$0 sm:$0xff]  ;;  %vm596_vm9 = vcmask 261120  }
 0x44b   : > { %v595_v57 = vadd.f32 %v781_v56, %v587_v55 }
 0x44d   : > { %597 = vst.msk [vmem:[%s329_s8] sm:$0xff] %vm596_vm9, %v595_v57 }
 0x44e PF: > { %s783_s22 = sshll.u32 %s1036_s24, 1  ;;  %s614_s7 = sshll.u32 %s329_s8, 4  ;;  %s615_s7 = int_to_ptr.vmem [resolvable:$true] %s614_s7 }
 0x44f   : > { %s610_s21 = sadd.s32 %s1032_s23, %s783_s22  ;;  %s1345_s16 = sand.u32 1, %s1016_s19  }
 0x450   : > { %s784_s10 = sshll.u32 %s610_s21, 7  ;;  %s599_s14 = scalar_lea.sflag [#allocation7], %s1345_s16 }
 0x451   : > { %s612_s30 = scalar_lea.hbm %s1320_s5, %s784_s10  ;;  %s932_s13 = scalar_lea.vmem %s615_s7, 128 }
 0x452   : > { %p933_p0 = scmp.ne.s32.totalorder %s615_s7, %s932_s13  ;;  %s1067_s15 = smov [#allocation6]  }
 0x453   : > { %s936_s9 = sshll.u32 %s1067_s15, 4  ;;  %s937_s9 = int_to_ptr.vmem [resolvable:$false] %s936_s9 }
 0x454   : > { %p934_p1 = pnand %p933_p0, %p1171_p5  ;;  %s938_s24 = scalar_lea.vmem %s937_s9, 256 }
 0x455   : > { %p939_p3 = scmp.lt.s32.totalorder %s615_s7, %s937_s9  ;;  %p940_p4 = scmp.lt.s32.totalorder %s938_s24, %s932_s13 }
 0x456   : > { %p935_p2 = pneg %p934_p1 }
 0x457   : > { %p941_p6 = por %p940_p4, %p939_p3 }
 0x459   : > { %p942_p8 = pnand %p941_p6, %p935_p2 }
 0x45b   : > { %945 = shalt.err (!%p942_p8)
}
 0x45c   : > { %s946_s23 = scalar_lea.hbm %s612_s30, 128  ;;  %s950_s18 = scalar_lea.hbm %s1320_s5, 512 }
 0x45d   : > { %p947_p9 = scmp.ne.s32.totalorder %s612_s30, %s946_s23  ;;  %p951_p12 = scmp.lt.s32.totalorder %s612_s30, %s1320_s5 }
 0x45e   : > { %p952_p13 = scmp.lt.s32.totalorder %s950_s18, %s946_s23 }
 0x45f   : > { %p948_p10 = pnand %p947_p9, %p1171_p5 }
 0x460   : > { %p953_p0 = por %p952_p13, %p951_p12 }
 0x461   : > { %p949_p11 = pneg %p948_p10 }
 0x463   : > { %p954_p1 = pnand %p953_p0, %p949_p11 }
 0x465   : > { %957 = shalt.err (!%p954_p1)
}
 0x466   : > { %811 = dma.vmem_to_hbm [thread:$0]  (%p1171_p5), %s615_s7, 128, %s612_s30, %s599_s14  }
 0x467 PF: > { %s1346_s26 = sld [smem:[#allocation9_spill]]  ;;  %p817_p2 = scmp.ge.s32.totalorder %s1056_s29, 2 }
 0x469   : > { %p814_p3 = pnand %p817_p2, %p1178_p7 }
 0x46b   : > { %p815_p4 = pneg %p814_p3 }
 0x46d   : > { %s626_s28 = sand.u32 1, %s1346_s26  }
 0x46e   : > { %s627_s22 = scalar_lea.sflag [#allocation7], %s626_s28 }
 0x46f   : > { %1007 = dma.done.wait (%p815_p4), %s627_s22, 128  }
 0x470   : > { %1009 = vsyncadd (%p815_p4), %s627_s22, 4294967168  ;;  %s18_s29 = sadd.s32 1, %s1056_s29   ;;  %s1348_s21 = sld [smem:[#allocation10_spill]] }
 0x471   : > { %p15_p6 = scmp.ge.s32.totalorder %s18_s29, 34   ;;  %s1349_s20 = sld [smem:[#allocation20_spill]] }
 0x472   : > { %s1350_s11 = sld [smem:[#allocation11_spill]]  ;;  %s1358_s18 = smov %s1016_s19 }
 0x473   : > { %s1351_s22 = sld [smem:[#allocation12_spill]] }
 0x474   : > { %s1352_s23 = sld [smem:[#allocation13_spill]] }
 0x475   : > { %s1353_s24 = sld [smem:[#allocation14_spill]]  ;;  %17 = sbr.rel (!%p15_p6) target bundleno = 7 (0x7), region = 98 }
 0x476   : > { %s1354_s25 = sld [smem:[#allocation15_spill]]  ;;  %s1359_s19 = smov %s1348_s21 }
 0x477   : > { %s1355_s26 = sld [smem:[#allocation16_spill]] }
 0x478   : > { %s1356_s27 = sld [smem:[#allocation18_spill]]  ;;  %s1360_s21 = smov %s1350_s11 }
 0x479   : > { %s1357_s28 = sld [smem:[#allocation19_spill]] }
 0x47a   :  { %632 = vsyncpa [#allocation7], 1 }
 0x47b   :  { %634 = vsyncpa [#allocation7 + $0x1], 1 }

// kernel: tpu_custom_call.1
= control target key start
LH: loop header
LB: loop body
LE: loop exit
PB: predicated region body
PF: predicated region fallthrough
CT: control target
= control target key end

     0   :  { %10 = vsyncpa [#allocation7], 0  ;;  %s1315_s0 = inlined_call_operand.vmem [shape: bf16[2,4,16,8], index: 0, kind: input, shape index: {}]   ;;  %s1316_s1 = inlined_call_operand.vmem [shape: bf16[2,4,16,8], index: 1, kind: input, shape index: {}]   ;;  %s1317_s2 = inlined_call_operand.vmem [shape: bf16[2,4,16,8], index: 2, kind: input, shape index: {}]   ;;  %s1318_s3 = inlined_call_operand.vmem [shape: bf16[4,8,32], index: 3, kind: input, shape index: {}]   ;;  %s1319_s4 = inlined_call_operand.vmem [shape: f32[1,32], index: 4, kind: input, shape index: {}]   ;;  %s1320_s5 = inlined_call_operand.hbm [shape: f32[2,16,32], index: 5, kind: output, shape index: {}]  }
   0x1   :  { %12 = vsyncpa [#allocation7 + $0x1], 0  ;;  %s1098_s18 = smov 0   ;;  %s1100_s19 = smov 0  }
   0x2   :  { %s1102_s20 = smov 0   ;;  %s1104_s21 = smov 0  }
   0x3   :  { %s1106_s22 = smov 0   ;;  %s1108_s23 = smov 0  }
   0x4   :  { %s1110_s24 = smov 0   ;;  %s1112_s25 = smov 0  }
   0x5   :  { %s1114_s26 = smov 0   ;;  %s1116_s27 = smov 0  }
   0x6   :  { %s1118_s28 = smov 0   ;;  %s1120_s29 = smov 0  }
   0x7 LB: > { %1331 = sst [smem:[#allocation9_spill]] %s1012_s18  ;;  %s760_s30 = sadd.s32 4294967295, %s1056_s29   ;;  %s1056_s29 = sphi %s1120_s29, %s18_s29   ;;  %s1052_s28 = sphi %s1118_s28, %s1357_s28   ;;  %s1048_s27 = sphi %s1116_s27, %s1356_s27   ;;  %s1044_s26 = sphi %s1114_s26, %s1355_s26   ;;  %s1040_s25 = sphi %s1112_s25, %s1354_s25   ;;  %s1036_s24 = sphi %s1110_s24, %s1353_s24   ;;  %s1032_s23 = sphi %s1108_s23, %s1352_s23   ;;  %s1028_s22 = sphi %s1106_s22, %s1351_s22   ;;  %s1024_s21 = sphi %s1104_s21, %s1360_s21   ;;  %s1020_s20 = sphi %s1102_s20, %s1349_s20   ;;  %s1016_s19 = sphi %s1100_s19, %s1359_s19   ;;  %s1012_s18 = sphi %s1098_s18, %s1358_s18  }
   0x8   : > { %1332 = sst [smem:[#allocation10_spill]] %s1020_s20  ;;  %s761_s6 = sadd.s32 4294967294, %s1056_s29  }
   0x9   : > { %1333 = sst [smem:[#allocation11_spill]] %s1040_s25  ;;  %s33_s7 = sadd.s32 1, %s1040_s25 }
   0xa   : > { %1334 = sst [smem:[#allocation12_spill]] %s1044_s26  ;;  %p34_p0 = scmp.ge.s32.totalorder %s33_s7, 2 }
   0xb   : > { %1335 = sst [smem:[#allocation13_spill]] %s1048_s27  ;;  %s36_s8 = sadd.s32 1, %s1044_s26 }
   0xc   : > { %1336 = sst [smem:[#allocation14_spill]] %s1052_s28  ;;  %s40_s9 = sadd.s32 1, %s1048_s27 }
   0xd   : > { %s44_s10 = sadd.s32 1, %s1052_s28  ;;  %s1362_s7 = smov (%p34_p0, %s33_s7), 0 }
   0xe   : > { %1337 = sst [smem:[#allocation15_spill]] %s1362_s7  ;;  %s1364_s8 = smov (!%p34_p0, %s36_s8), %s1044_s26 }
   0xf   : > { %p195_p1 = scmp.ne.s32.totalorder %s1020_s20, %s1016_s19  ;;  %p196_p2 = scmp.eq.s32.totalorder %s760_s30, 31 }
  0x10   : > { %p38_p3 = scmp.ge.s32.totalorder %s1364_s8, 4  ;;  %p201_p4 = scmp.ne.s32.totalorder %s1016_s19, %s1012_s18 }
  0x11   : > { %p1171_p5 = por %p196_p2, %p195_p1  ;;  %p202_p6 = scmp.eq.s32.totalorder %s761_s6, 31 }
  0x12   : > { %s1366_s8 = smov (%p38_p3, %s1364_s8), 0  ;;  %s1368_s9 = smov (!%p38_p3, %s40_s9), %s1048_s27 }
  0x13   : > { %1339 = sst [smem:[#allocation16_spill]] %s1366_s8  ;;  %p1178_p7 = por %p202_p6, %p201_p4 }
  0x14   : > { %p764_p8 = scmp.ge.s32.totalorder %s1056_s29, 1  ;;  %p42_p9 = scmp.ge.s32.totalorder %s1368_s9, 2 }
  0x15   : > { %s1340_s12 = scalar_select %p1178_p7, 1, 0 }
  0x16   : > { %p271_p10 = scmp.lt.s32.totalorder %s1056_s29, 33  ;;  %s1370_s9 = smov (%p42_p9, %s1368_s9), 0 }
  0x17   : > { %1341 = sst [smem:[#allocation17_spill]] %s1340_s12  ;;  %s1372_s10 = smov (!%p42_p9, %s44_s10), %s1052_s28 }
  0x18   : > { %1342 = sst [smem:[#allocation18_spill]] %s1370_s9  ;;  %p272_p11 = pnand %p764_p8, %p271_p10 }
  0x19   : > { %p46_p12 = scmp.ge.s32.totalorder %s1372_s10, 2  ;;  %s181_s13 = ssub.s32 %s1048_s27, %s1370_s9 }
  0x1a   : > { %s185_s16 = sadd.s32 1, %s1020_s20  ;;  %s1326_s30 = sand.u32 (!%p272_p11), 1, %s1016_s19  }
  0x1b   : > { %s1374_s10 = smov (%p46_p12, %s1372_s10), 0  ;;  %p330_p0 = scmp.lt.s32.totalorder (!%p272_p11), %s1036_s24, 1 }
  0x1c   : > { %1343 = sst [smem:[#allocation19_spill]] %s1374_s10  ;;  %s180_s14 = ssub.s32 %s1052_s28, %s1374_s10 }
  0x1d   : > { %s182_s15 = sor.u32 %s181_s13, %s180_s14  ;;  %s1201_s6 = sshll.u32 (!%p272_p11), %s1326_s30, 3 }
  0x1e   : > { %p183_p13 = scmp.eq.s32.totalorder %s182_s15, 0  ;;  %275 = sbr.rel (%p272_p11) target bundleno = 1127 (0x467), region = 40 }
  0x1f   : > { %p332_p1 = scmp.lt.s32.totalorder (!%p272_p11), %s1028_s22, 3  ;;  %p334_p2 = scmp.lt.s32.totalorder (!%p272_p11), %s1032_s23, 1 }
  0x20   : > { %s1195_s17 = scalar_select %p183_p13, %s1020_s20, %s185_s16  }
  0x21   : > { %p346_p3 = scmp.lt.s32.totalorder (!%p272_p11), %s1024_s21, 1  ;;  %p367_p4 = scmp.eq.s32.totalorder (!%p272_p11), %s1028_s22, 0 }
  0x22   : > { %1344 = sst [smem:[#allocation20_spill]] %s1195_s17  ;;  %p368_p6 = scmp.eq.s32.totalorder (!%p272_p11), %s1024_s21, 0 }
  0x23   : > { %s331_s13 = scalar_select %p330_p0, %s1036_s24, 1 }
  0x24   : > { %s333_s14 = scalar_select %p332_p1, %s1028_s22, 3 }
  0x25   : > { %s335_s15 = scalar_select %p334_p2, %s1032_s23, 1 }
  0x26   : > { %s766_s16 = sshll.u32 %s333_s14, 1  ;;  %s767_s10 = sshll.u32 %s331_s13, 3 }
  0x27   : > { %s337_s9 = sadd.s32 %s766_s16, %s335_s15  ;;  %p369_p8 = pnand %p368_p6, %p367_p4 }
  0x28   : > { %s339_s8 = sadd.s32 %s767_s10, %s337_s9 }
  0x29   : > { %s768_s7 = sshll.u32 %s339_s8, 2  ;;  %s329_s8 = scalar_lea.vmem [#allocation6], %s1201_s6 }
  0x2a   : > { %s1214_s26 = scalar_lea.vmem %s1315_s0, %s768_s7 }
  0x2b   : > { %s347_s30 = scalar_select %p346_p3, %s1024_s21, 1 }
  0x2c   : > { %372 = sbr.rel (%p369_p8) target bundleno = 51 (0x33), region = 44 }
  0x2d   : > { %s349_s25 = sadd.s32 %s766_s16, %s347_s30 }
  0x2e   : > { %s351_s17 = sadd.s32 %s767_s10, %s349_s25 }
  0x2f   : > { %s771_s20 = sshll.u32 %s351_s17, 2 }
  0x30   : > { %s353_s13 = scalar_lea.vmem %s1316_s1, %s771_s20  ;;  %s1223_s9 = scalar_lea.vmem %s1317_s2, %s771_s20 }
  0x31   : > { %vm373_vm0 = vcmask 261120   ;;  %v1058_v0 = vmov 0.0  }
  0x32   : > { %374 = vst.msk [vmem:[#allocation5] sm:$0xff] %vm373_vm0, %v1058_v0 }
  0x33 PF: > { %p775_p9 = scmp.ne.s32.totalorder %s1024_s21, 0 }
  0x35   : > { %377 = sbr.rel (%p775_p9) target bundleno = 61 (0x3d), region = 48 }
  0x3a   : > { %vm378_vm1 = vcmask 7168   ;;  %vm381_vm2 = vcmask 64512   ;;  %v1059_v1 = vmov -inf   ;;  %v1060_v2 = vmov 0.0  }
  0x3b   : > { %379 = vst.msk [vmem:[#allocation2] sm:$0xff] %vm378_vm1, %v1059_v1  ;;  %380 = vst.msk [vmem:[#allocation3] sm:$0xff] %vm378_vm1, %v1060_v2 }
  0x3c   : > { %382 = vst.msk [vmem:[#allocation4] sm:$0xff] %vm381_vm2, %v1060_v2 }
  0x3d PF: > { %v384_v3 = vld [vmem:[%s353_s13] sm:$0xf]  ;;  %vm386_vm3 = vcmask 64512   ;;  %v1061_v4 = vmov 0.0   ;;  %vm1062_vm4 = vmmov 0   ;;  %v1063_v12 = vmov 0  }
  0x3e   : > { %793 = vmatprep.subr.bf16.mxu0 %v1061_v4  ;;  %v391_v5 = vsel %vm386_vm3, %v384_v3, 0  ;;  %795 = vmatprep.mubr.msk.bf16.mxu0 %vm1062_vm4, %v1061_v4  ;;  %v383_v6 = vld [vmem:[%s1214_s26] sm:$0xf]  ;;  %vm455_vm5 = vcmask 7168   ;;  %vm468_vm6 = vcmask 1043456   ;;  %p515_p10 = scmp.eq.s32.totalorder %s1024_s21, 1 }
  0x3f   : > { %794 = vmatpush3.bf16.xpose.msra.mxu0 %v391_v5  ;;  %799 = vmatprep.subr.bf16.mxu1 %v1061_v4  ;;  %v385_v17 = vld [vmem:[%s1223_s9] sm:$0xf]  ;;  %p778_p11 = scmp.ne.s32.totalorder %s1024_s21, 1 }
  0x40   : > { %801 = vmatprep.mubr.msk.bf16.mxu1 %vm1062_vm4, %v1061_v4  ;;  %923 = vset.pattern.permute.xlu0 %v1063_v12  ;;  %v470_v18 = vsel %vm468_vm6, %v385_v17, 0  ;;  %s779_s18 = sshll.u32 (!%p778_p11), %s1028_s22, 2 }
  0x41   : > { %924 = vset.pattern.permute.xlu1 %v1063_v12  ;;  %800 = vmatpush3.bf16.msra.mxu1 %v470_v18  ;;  %s531_s26 = scalar_lea.vmem (!%p778_p11), %s1318_s3, %s779_s18 }
  0x42   : > { %v433_v13 = vld [vmem:[#allocation2] sm:$0xff]  ;;  %v449_v27 = vld [vmem:[#allocation3] sm:$0xff] }
  0x43   : > { %v457_v31 = vld [vmem:[#allocation4] sm:$0xff] }
  0x46   : > { %796 = vmatmul.mubr.msk.bf16.vlgmr.msra.gmra.mxu0 %vm386_vm3, %v383_v6 }
 0x106   : > { %v427_v7 = vpop.f32.mrf.mxu0 }
 0x107   : > { %v434_v8 = vsel %vm386_vm3, %v427_v7, -inf }
 0x108   : > { %435 = vmax.xlane.f32.xlu0 %v434_v8  ;;  %v797_v9 = vpop.f32.mrf.mxu0 }
 0x10a   : > { %v430_v10 = vpop.f32.mrf.mxu0 }
 0x10c   : > { %v798_v11 = vpop.f32.mrf.mxu0 }
 0x191   : > { %v436_v14 = vpop.xlane.xlu0 %435 }
 0x192   : > { %v437_v15 = vmax.f32 %v433_v13, %v436_v14 }
 0x194   : > { %v438_v16 = vsub.f32 %v433_v13, %v437_v15  ;;  %514 = vst.msk [vmem:[#allocation2] sm:$0xff] %vm455_vm5, %v437_v15  ;;  %443 = vperm.xlu0 %923, %v437_v15  }
 0x196   : > { %v439_v23 = vmul.f32 1.442695, %v438_v16 }
 0x20f   : > { %v444_v19 = vpop.permute.xlu0 %443 }
 0x210   : > { %v446_v20 = vsub.f32 %v427_v7, %v444_v19 }
 0x212   : > { %v447_v21 = vmul.f32 1.442695, %v446_v20 }
 0x214   : > { %925 = vpow2.f32 %v447_v21 }
 0x215   : > { %927 = vpow2.f32 %v439_v23 }
 0x221   : > { %v926_v22 = vpop.eup %925 }
 0x222   : > { %v451_v24 = vsel %vm386_vm3, %v926_v22, 0.0  ;;  %v464_v25 = vpack.c.bf16 %v926_v22, %v926_v22  ;;  %v928_v26 = vpop.eup %927 }
 0x223   : > { %452 = vadd.xlane.f32.xlu1 %v451_v24  ;;  %v450_v28 = vmul.f32 %v928_v26, %v449_v27 }
 0x224   : > { %802 = vmatmul.mubr.msk.bf16.vlgmr.msra.gmra.mxu1 %vm386_vm3, %v464_v25 }
 0x234   : > { %460 = vperm.xlu1 %924, %v928_v26  }
 0x2ac   : > { %v453_v29 = vpop.xlane.xlu1 %452 }
 0x2ad   : > { %v454_v30 = vadd.f32 %v453_v29, %v450_v28 }
 0x2af   : > { %456 = vst.msk [vmem:[#allocation3] sm:$0xff] %vm455_vm5, %v454_v30 }
 0x2b0   : > { %v461_v32 = vpop.permute.xlu1 %460 }
 0x2b1   : > { %v463_v33 = vmul.f32 %v461_v32, %v457_v31 }
 0x2e4   : > { %v506_v34 = vpop.f32.mrf.mxu1 }
 0x2e5   : > { %v512_v35 = vadd.f32 %v506_v34, %v463_v33 }
 0x2e6   : > { %v803_v36 = vpop.f32.mrf.mxu1  ;;  %518 = sbr.rel (%p778_p11) target bundleno = 1089 (0x441), region = 52 }
 0x2e7   : > { %513 = vst.msk [vmem:[#allocation4] sm:$0xff] %vm386_vm3, %v512_v35 }
 0x2e8   : > { %v509_v37 = vpop.f32.mrf.mxu1 }
 0x2ea   : > { %v804_v38 = vpop.f32.mrf.mxu1 }
 0x2eb   : > { %v519_v39 = vld [vmem:[#allocation3] sm:$0xff]  ;;  %v1064_v40 = vmov 0   ;;  %v532_v41 = vld [vmem:[%s531_s26] sm:$0xf]  ;;  %v1065_v42 = vmov 0.0   ;;  %vm1066_vm7 = vmmov 0  }
 0x2ec   : > { %929 = vset.pattern.permute.xlu0 %v1064_v40  ;;  %930 = vrcp.f32 %v519_v39  ;;  %805 = vmatprep.subr.bf16.mxu0 %v1065_v42  ;;  %v537_v43 = vsel %vm468_vm6, %v532_v41, 0  ;;  %v529_v49 = vld [vmem:[#allocation5] sm:$0xff]  ;;  %vm580_vm8 = vcmask 261120  }
 0x2ed   : > { %806 = vmatpush3.bf16.msra.mxu0 %v537_v43  ;;  %807 = vmatprep.mubr.msk.bf16.mxu0 %vm1066_vm7, %v1065_v42 }
 0x2ee   : > { %v521_v45 = vld [vmem:[#allocation4] sm:$0xff] }
 0x2f9   : > { %v931_v44 = vpop.eup %930 }
 0x2fa   : > { %524 = vperm.xlu0 %929, %v931_v44  }
 0x375   : > { %v525_v46 = vpop.permute.xlu0 %524 }
 0x376   : > { %v527_v47 = vmul.f32 %v525_v46, %v521_v45 }
 0x378   : > { %v528_v48 = vpack.c.bf16 %v527_v47, %v527_v47 }
 0x37a   : > { %808 = vmatmul.mubr.msk.bf16.vlgmr.msra.gmra.mxu0 %vm386_vm3, %v528_v48 }
 0x43a   : > { %v573_v50 = vpop.f32.mrf.mxu0 }
 0x43b   : > { %v579_v51 = vadd.f32 %v573_v50, %v529_v49 }
 0x43c   : > { %v809_v52 = vpop.f32.mrf.mxu0 }
 0x43d   : > { %581 = vst.msk [vmem:[#allocation5] sm:$0xff] %vm580_vm8, %v579_v51 }
 0x43e   : > { %v576_v53 = vpop.f32.mrf.mxu0 }
 0x440   : > { %v810_v54 = vpop.f32.mrf.mxu0 }
 0x441 PF: > { %p582_p12 = scmp.eq.s32.totalorder %s1028_s22, 3 }
 0x443   : > { %p583_p13 = pnand %p582_p12, %p515_p10 }
 0x445   : > { %586 = sbr.rel (%p583_p13) target bundleno = 1102 (0x44e), region = 56 }
 0x44a   : > { %v587_v55 = vld [vmem:[#allocation5] sm:$0xff]  ;;  %v781_v56 = vld [vmem:[%s1319_s4] ss:$0 sm:$0xff]  ;;  %vm596_vm9 = vcmask 261120  }
 0x44b   : > { %v595_v57 = vadd.f32 %v781_v56, %v587_v55 }
 0x44d   : > { %597 = vst.msk [vmem:[%s329_s8] sm:$0xff] %vm596_vm9, %v595_v57 }
 0x44e PF: > { %s783_s22 = sshll.u32 %s1036_s24, 1  ;;  %s614_s7 = sshll.u32 %s329_s8, 4  ;;  %s615_s7 = int_to_ptr.vmem [resolvable:$true] %s614_s7 }
 0x44f   : > { %s610_s21 = sadd.s32 %s1032_s23, %s783_s22  ;;  %s1345_s16 = sand.u32 1, %s1016_s19  }
 0x450   : > { %s784_s10 = sshll.u32 %s610_s21, 7  ;;  %s599_s14 = scalar_lea.sflag [#allocation7], %s1345_s16 }
 0x451   : > { %s612_s30 = scalar_lea.hbm %s1320_s5, %s784_s10  ;;  %s932_s13 = scalar_lea.vmem %s615_s7, 128 }
 0x452   : > { %p933_p0 = scmp.ne.s32.totalorder %s615_s7, %s932_s13  ;;  %s1067_s15 = smov [#allocation6]  }
 0x453   : > { %s936_s9 = sshll.u32 %s1067_s15, 4  ;;  %s937_s9 = int_to_ptr.vmem [resolvable:$false] %s936_s9 }
 0x454   : > { %p934_p1 = pnand %p933_p0, %p1171_p5  ;;  %s938_s24 = scalar_lea.vmem %s937_s9, 256 }
 0x455   : > { %p939_p3 = scmp.lt.s32.totalorder %s615_s7, %s937_s9  ;;  %p940_p4 = scmp.lt.s32.totalorder %s938_s24, %s932_s13 }
 0x456   : > { %p935_p2 = pneg %p934_p1 }
 0x457   : > { %p941_p6 = por %p940_p4, %p939_p3 }
 0x459   : > { %p942_p8 = pnand %p941_p6, %p935_p2 }
 0x45b   : > { %945 = shalt.err (!%p942_p8)
}
 0x45c   : > { %s946_s23 = scalar_lea.hbm %s612_s30, 128  ;;  %s950_s18 = scalar_lea.hbm %s1320_s5, 512 }
 0x45d   : > { %p947_p9 = scmp.ne.s32.totalorder %s612_s30, %s946_s23  ;;  %p951_p12 = scmp.lt.s32.totalorder %s612_s30, %s1320_s5 }
 0x45e   : > { %p952_p13 = scmp.lt.s32.totalorder %s950_s18, %s946_s23 }
 0x45f   : > { %p948_p10 = pnand %p947_p9, %p1171_p5 }
 0x460   : > { %p953_p0 = por %p952_p13, %p951_p12 }
 0x461   : > { %p949_p11 = pneg %p948_p10 }
 0x463   : > { %p954_p1 = pnand %p953_p0, %p949_p11 }
 0x465   : > { %957 = shalt.err (!%p954_p1)
}
 0x466   : > { %811 = dma.vmem_to_hbm [thread:$0]  (%p1171_p5), %s615_s7, 128, %s612_s30, %s599_s14  }
 0x467 PF: > { %s1346_s26 = sld [smem:[#allocation9_spill]]  ;;  %p817_p2 = scmp.ge.s32.totalorder %s1056_s29, 2 }
 0x469   : > { %p814_p3 = pnand %p817_p2, %p1178_p7 }
 0x46b   : > { %p815_p4 = pneg %p814_p3 }
 0x46d   : > { %s626_s28 = sand.u32 1, %s1346_s26  }
 0x46e   : > { %s627_s22 = scalar_lea.sflag [#allocation7], %s626_s28 }
 0x46f   : > { %1007 = dma.done.wait (%p815_p4), %s627_s22, 128  }
 0x470   : > { %1009 = vsyncadd (%p815_p4), %s627_s22, 4294967168  ;;  %s18_s29 = sadd.s32 1, %s1056_s29   ;;  %s1348_s21 = sld [smem:[#allocation10_spill]] }
 0x471   : > { %p15_p6 = scmp.ge.s32.totalorder %s18_s29, 34   ;;  %s1349_s20 = sld [smem:[#allocation20_spill]] }
 0x472   : > { %s1350_s11 = sld [smem:[#allocation11_spill]]  ;;  %s1358_s18 = smov %s1016_s19 }
 0x473   : > { %s1351_s22 = sld [smem:[#allocation12_spill]] }
 0x474   : > { %s1352_s23 = sld [smem:[#allocation13_spill]] }
 0x475   : > { %s1353_s24 = sld [smem:[#allocation14_spill]]  ;;  %17 = sbr.rel (!%p15_p6) target bundleno = 7 (0x7), region = 98 }
 0x476   : > { %s1354_s25 = sld [smem:[#allocation15_spill]]  ;;  %s1359_s19 = smov %s1348_s21 }
 0x477   : > { %s1355_s26 = sld [smem:[#allocation16_spill]] }
 0x478   : > { %s1356_s27 = sld [smem:[#allocation18_spill]]  ;;  %s1360_s21 = smov %s1350_s11 }
 0x479   : > { %s1357_s28 = sld [smem:[#allocation19_spill]] }
 0x47a   :  { %632 = vsyncpa [#allocation7], 1 }
 0x47b   :  { %634 = vsyncpa [#allocation7 + $0x1], 1 }

</bundles_post_ra>
